<compile_context>
chip_gen: v7x
topology: tpu7x:2x2x1
jax: 0.10.0
libtpu: 0.0.40
codegen_flags: <defaults>
</compile_context>

<pallas_src>
import functools

import jax
import jax.numpy as jnp
from jax.experimental import pallas as pl
from jax.experimental.pallas import tpu as pltpu

_SUBLANES = 8
_LANE_WIDTHS = (1024, 512, 256, 128)     # candidate lane-dense last dims
_TARGET_BLOCK_ELEMS = 2 * 1024 * 1024    # ~8 MiB f32 per input per block
_MAX_LIVE_VMEM_BYTES = 40 << 20          # cap: 2 inputs x 2 buffers (v7x: 64 MiB VMEM)


def _num_tensorcores_per_chip():
    """2 on v7x-class chips (2 TensorCores/chip), 1 on v5e/v6e; safe default 1."""
    try:
        kind = (jax.devices()[0].device_kind or "").lower()
    except Exception:
        return 1
    return 2 if "v7" in kind else 1


def _focal_elemwise_f32(p, t, alpha, gamma):
    """Exact torch math (general targets), elementwise, f32. Used for tiny tails."""
    p = p.astype(jnp.float32)
    t = t.astype(jnp.float32)
    bce = -(t * jnp.maximum(jnp.log(p), -100.0)
            + (1.0 - t) * jnp.maximum(jnp.log(1.0 - p), -100.0))
    pt = jnp.exp(-bce)
    return alpha * (1.0 - pt) ** gamma * bce


def _focal_loss_kernel(x_ref, t_ref, o_ref, *, alpha, gamma, rows_total,
                       tail_start, blocks_per_core, two_cores,
                       binary_targets, needs_mask):
    if two_cores:
        c = pl.program_id(0)           # core-parallel axis (v7x only)
        j = pl.program_id(1)           # reduction axis
        block_idx = c * blocks_per_core + j
    else:
        j = pl.program_id(0)           # reduction axis
        block_idx = j

    @pl.when(j == 0)
    def _():
        o_ref[...] = jnp.zeros_like(o_ref)

    p = x_ref[...].astype(jnp.float32)
    t = t_ref[...].astype(jnp.float32)

    if binary_targets:
        # Binary targets: pt is p or 1-p (one select), 1 log / element, no exp.
        # Matches torch's binary_cross_entropy log-clamp at -100.
        pt = jnp.where(t != 0.0, p, 1.0 - p)
        bce = jnp.minimum(-jnp.log(pt), 100.0)
        one_minus_pt = 1.0 - pt
    else:
        # General (fractional-target) path: exact torch math.
        log_p = jnp.maximum(jnp.log(p), -100.0)
        log_1mp = jnp.maximum(jnp.log(1.0 - p), -100.0)
        bce = -(t * log_p + (1.0 - t) * log_1mp)
        one_minus_pt = 1.0 - jnp.exp(-bce)

    if gamma == 2.0:
        mod = one_minus_pt * one_minus_pt     # avoid pow -> log/exp lowering
    elif gamma == 1.0:
        mod = one_minus_pt
    elif gamma == 0.0:
        mod = jnp.ones_like(one_minus_pt)
    else:
        mod = one_minus_pt ** gamma

    f = mod * bce
    if alpha != 1.0:                          # skip the multiply for alpha == 1
        f = alpha * f

    T, W = f.shape

    def accumulate(vals):
        # (T, W) -> (T//8, 8, W); reducing the leading axis is pure vreg-wise
        # VPU adds.  The final cross-lane scalar reduce happens in the wrapper.
        o_ref[...] += vals.reshape(T // _SUBLANES, _SUBLANES, W).sum(axis=0)

    if needs_mask:
        # Only boundary / duplicated blocks pay the iota + cmp + select mask;
        # interior blocks accumulate unmasked.  The mask is applied BEFORE the
        # reduction so garbage (OOB VMEM) rows can never contaminate the sum.
        is_tail = block_idx >= tail_start

        @pl.when(jnp.logical_not(is_tail))
        def _():
            accumulate(f)

        @pl.when(is_tail)
        def _():
            base_row = block_idx * T
            row_idx = base_row + jax.lax.broadcasted_iota(jnp.int32, (T, W), 0)
            accumulate(jnp.where(row_idx < rows_total, f, 0.0))
    else:
        accumulate(f)


def focal_loss(inputs, targets, *, alpha=1.0, gamma=2.0, binary_targets=True,
               block_elems=_TARGET_BLOCK_ELEMS):
    """Mean focal loss over all elements (logits=False, reduce=True).

    `targets` may be passed in a narrower dtype (e.g. bfloat16 / int8 for
    known-binary labels); the kernel DMAs the native dtype and upcasts per
    tile, so narrowing the target stream cuts HBM traffic on this
    memory-bound kernel.  `binary_targets=True` assumes targets are exactly
    {0, 1}; use binary_targets=False for fractional targets.
    """
    assert inputs.shape == targets.shape
    n_valid = int(inputs.size)

    x = inputs.reshape(-1)   # layout-only flatten; keep native dtype
    t = targets.reshape(-1)

    # Widest lane-dense width W with size % (8*W) == 0 -> pure reshape, no copy.
    width = None
    for w in _LANE_WIDTHS:
        if n_valid % (_SUBLANES * w) == 0:
            width = w
            break

    tail_sum = jnp.float32(0.0)
    if width is None:
        # Unaligned size: do NOT pad the full arrays (extra HBM pass).  Run the
        # kernel on the aligned prefix; fold the < 8*128-element remainder in
        # with a tiny pure-JAX epilogue.
        width = 128
        chunk = _SUBLANES * width
        n_main = (n_valid // chunk) * chunk
        if n_main == 0:
            f = _focal_elemwise_f32(x, t, alpha, gamma)
            return jnp.sum(f) / jnp.float32(n_valid)
        tail_sum = jnp.sum(_focal_elemwise_f32(x[n_main:], t[n_main:], alpha, gamma))
        x = x[:n_main]
        t = t[:n_main]

    rows = x.size // width               # always a multiple of 8
    x2 = x.reshape(rows, width)
    t2 = t.reshape(rows, width)

    # Tile sizing: big streaming tiles, capped so 2 inputs x 2 buffers of the
    # chosen tile stay under _MAX_LIVE_VMEM_BYTES (v7x has only 64 MiB VMEM).
    in_bytes = x2.dtype.itemsize + t2.dtype.itemsize
    rows_target = max(_SUBLANES, (block_elems // width) // _SUBLANES * _SUBLANES)
    rows_cap = max(_SUBLANES,
                   (_MAX_LIVE_VMEM_BYTES // (2 * width * in_bytes))
                   // _SUBLANES * _SUBLANES)
    rows_per_block = min(rows, rows_target, rows_cap)

    blocks_total = pl.cdiv(rows, rows_per_block)
    two_cores = (_num_tensorcores_per_chip() == 2) and (blocks_total >= 2)
    ncores = 2 if two_cores else 1
    blocks_per_core = pl.cdiv(blocks_total, ncores)
    needs_mask = (ncores * blocks_per_core * rows_per_block) != rows
    tail_start = rows // rows_per_block   # first block index needing the mask

    kernel = functools.partial(
        _focal_loss_kernel,
        alpha=float(alpha), gamma=float(gamma), rows_total=rows,
        tail_start=tail_start, blocks_per_core=blocks_per_core,
        two_cores=two_cores, binary_targets=bool(binary_targets),
        needs_mask=needs_mask,
    )

    if two_cores:
        grid = (ncores, blocks_per_core)

        def in_index(c, j):
            # Clamp so duplicated tail blocks never start fully out of bounds;
            # the in-kernel row mask zeroes duplicated / OOB rows.
            return (jnp.minimum(c * blocks_per_core + j, blocks_total - 1), 0)

        out_index = lambda c, j: (c, 0)
        dim_sems = (pltpu.CORE_PARALLEL, pltpu.ARBITRARY)
    else:
        grid = (blocks_total,)
        in_index = lambda j: (j, 0)
        out_index = lambda j: (0, 0)
        dim_sems = (pltpu.ARBITRARY,)

    # Explicit scoped-VMEM limit: 2 inputs x 2 buffers of a tile + output +
    # headroom, floored at 32 MiB and capped well under v7x's 64 MiB VMEM.
    tile_bytes = rows_per_block * width * in_bytes     # one tile, both inputs
    out_bytes = ncores * _SUBLANES * width * 4
    vmem_limit = int(min(max(2 * tile_bytes + out_bytes + (8 << 20), 32 << 20),
                         56 << 20))

    partials = pl.pallas_call(
        kernel,
        out_shape=jax.ShapeDtypeStruct((ncores * _SUBLANES, width), jnp.float32),
        grid_spec=pltpu.PrefetchScalarGridSpec(
            num_scalar_prefetch=0,
            grid=grid,
            in_specs=[
                pl.BlockSpec((rows_per_block, width), in_index),
                pl.BlockSpec((rows_per_block, width), in_index),
            ],
            out_specs=pl.BlockSpec((_SUBLANES, width), out_index),
        ),
        compiler_params=pltpu.CompilerParams(
            dimension_semantics=dim_sems,
            vmem_limit_bytes=vmem_limit,
        ),
    )(x2, t2)

    # TODO(synk): partial sums accumulate in f32 per lane; for N >> 1e9 a
    # pairwise/segmented accumulation would reduce drift.
    return (jnp.sum(partials) + tail_sum) / jnp.float32(n_valid)


def _reference_focal_loss(inputs, targets, alpha=1.0, gamma=2.0):
    return jnp.mean(_focal_elemwise_f32(inputs, targets, alpha, gamma))


if __name__ == "__main__":
    key = jax.random.PRNGKey(0)
    k1, k2, k3, k4, k5, k6 = jax.random.split(key, 6)

    # 1) Main check: NCHW probabilities vs binary labels (module defaults).
    shape = (2, 4, 16, 16)
    inputs = jax.random.uniform(k1, shape, jnp.float32, minval=0.01, maxval=0.99)
    targets = (jax.random.uniform(k2, shape, jnp.float32) > 0.5).astype(jnp.float32)
    out = jax.block_until_ready(focal_loss(inputs, targets, alpha=1.0, gamma=2.0))
    ref = _reference_focal_loss(inputs, targets)
    assert jnp.allclose(out, ref, rtol=1e-4, atol=1e-6), (out, ref)

    # 2) Unaligned element count (< 8*128): exercises the pure-JAX fallback.
    shape2 = (2, 3, 11, 13)
    inputs2 = jax.random.uniform(k3, shape2, jnp.float32, minval=0.01, maxval=0.99)
    targets2 = (jax.random.uniform(k4, shape2, jnp.float32) > 0.5).astype(jnp.float32)
    out2 = jax.block_until_ready(focal_loss(inputs2, targets2))
    ref2 = _reference_focal_loss(inputs2, targets2)
    assert jnp.allclose(out2, ref2, rtol=1e-4, atol=1e-6), (out2, ref2)

    # 3) Multi-block grid + pl.when-gated tail row mask (small block_elems).
    shape3 = (2, 3, 16, 32)   # 3072 elements -> width 128, 24 rows, rpb 16
    inputs3 = jax.random.uniform(k5, shape3, jnp.float32, minval=0.01, maxval=0.99)
    targets3 = (jax.random.uniform(k6, shape3, jnp.float32) > 0.5).astype(jnp.float32)
    out3 = jax.block_until_ready(focal_loss(inputs3, targets3, block_elems=2048))
    ref3 = _reference_focal_loss(inputs3, targets3)
    assert jnp.allclose(out3, ref3, rtol=1e-4, atol=1e-6), (out3, ref3)

    # 4) Aligned prefix + tiny pure-JAX epilogue (unaligned but > 8*128 elems).
    shape4 = (2, 4, 16, 17)   # 2176 elements -> 2048 in-kernel + 128 epilogue
    inputs4 = jax.random.uniform(k1, shape4, jnp.float32, minval=0.01, maxval=0.99)
    targets4 = (jax.random.uniform(k2, shape4, jnp.float32) > 0.5).astype(jnp.float32)
    out4 = jax.block_until_ready(focal_loss(inputs4, targets4))
    ref4 = _reference_focal_loss(inputs4, targets4)
    assert jnp.allclose(out4, ref4, rtol=1e-4, atol=1e-6), (out4, ref4)

    # 5) Narrow target dtype (bf16 labels are exact for {0,1}) — less HBM traffic.
    out5 = jax.block_until_ready(focal_loss(inputs, targets.astype(jnp.bfloat16)))
    assert jnp.allclose(out5, ref, rtol=1e-4, atol=1e-6), (out5, ref)

    print("KERNEL_OK")
</pallas_src>

<mosaic_0001>
module attributes {stable_mosaic.version = 11 : i64} {
  func.func @_focal_loss_kernel(%arg0: i32, %arg1: memref<8x256xf32, #tpu.memory_space<vmem>>, %arg2: memref<8x256xf32, #tpu.memory_space<vmem>>, %arg3: memref<8x256xf32, #tpu.memory_space<vmem>>) attributes {dimension_semantics = [#tpu.dimension_semantics<arbitrary>], iteration_bounds = array<i64: 1>, scalar_prefetch = 0 : i64, scratch_operands = 0 : i64, tpu.core_type = #tpu.core_type<tc>, window_params = [{transform_indices = @transform_0, window_bounds = array<i64: 8, 256>}, {transform_indices = @transform_1, window_bounds = array<i64: 8, 256>}, {pipeline_mode = #tpu.pipeline_mode<synchronous>, transform_indices = @transform_2, window_bounds = array<i64: 8, 256>}]} {
    %c0_i32 = arith.constant 0 : i32
    %0 = arith.cmpi eq, %arg0, %c0_i32 : i32
    %1 = arith.extui %0 : i1 to i32
    %c0_i32_0 = arith.constant 0 : i32
    %2 = arith.cmpi ne, %1, %c0_i32_0 : i32
    scf.if %2 {
      %cst_13 = arith.constant 0.000000e+00 : f32
      %24 = vector.broadcast %cst_13 : f32 to vector<8x256xf32>
      %c0_14 = arith.constant 0 : index
      %c0_15 = arith.constant 0 : index
      %25 = vector.load %arg3[%c0_14, %c0_15] : memref<8x256xf32, #tpu.memory_space<vmem>>, vector<8x256xf32>
      tpu.vector_store %arg3[%c0_14, %c0_15], %24 {strides = array<i32>} : memref<8x256xf32, #tpu.memory_space<vmem>>, vector<8x256xf32>,
    } else {
    }
    %c0 = arith.constant 0 : index
    %c0_1 = arith.constant 0 : index
    %3 = vector.load %arg1[%c0, %c0_1] : memref<8x256xf32, #tpu.memory_space<vmem>>, vector<8x256xf32>
    %c0_2 = arith.constant 0 : index
    %c0_3 = arith.constant 0 : index
    %4 = vector.load %arg2[%c0_2, %c0_3] : memref<8x256xf32, #tpu.memory_space<vmem>>, vector<8x256xf32>
    %cst = arith.constant 0.000000e+00 : f32
    %5 = vector.broadcast %cst : f32 to vector<8x256xf32>
    %6 = arith.cmpf one, %4, %5 : vector<8x256xf32>
    %cst_4 = arith.constant 1.000000e+00 : f32
    %7 = vector.broadcast %cst_4 : f32 to vector<8x256xf32>
    %8 = arith.subf %7, %3 : vector<8x256xf32>
    %9 = arith.select %6, %3, %8 : vector<8x256xi1>, vector<8x256xf32>
    %10 = math.log %9 : vector<8x256xf32>
    %cst_5 = arith.constant 0.000000e+00 : f32
    %11 = vector.broadcast %cst_5 : f32 to vector<8x256xf32>
    %12 = arith.subf %11, %10 : vector<8x256xf32>
    %cst_6 = arith.constant 1.000000e+02 : f32
    %13 = vector.broadcast %cst_6 : f32 to vector<8x256xf32>
    %14 = arith.minimumf %12, %13 : vector<8x256xf32>
    %cst_7 = arith.constant 1.000000e+00 : f32
    %15 = vector.broadcast %cst_7 : f32 to vector<8x256xf32>
    %16 = arith.subf %15, %9 : vector<8x256xf32>
    %17 = arith.mulf %16, %16 : vector<8x256xf32>
    %18 = arith.mulf %17, %14 : vector<8x256xf32>
    %c0_8 = arith.constant 0 : index
    %c0_9 = arith.constant 0 : index
    %19 = vector.load %arg3[%c0_8, %c0_9] : memref<8x256xf32, #tpu.memory_space<vmem>>, vector<8x256xf32>
    %20 = vector.shape_cast %18 : vector<8x256xf32> to vector<1x8x256xf32>
    %cst_10 = arith.constant dense<0.000000e+00> : vector<8x256xf32>
    %21 = vector.multi_reduction <add>, %20, %cst_10 [0] : vector<1x8x256xf32> to vector<8x256xf32>
    %22 = arith.addf %19, %21 : vector<8x256xf32>
    %c0_11 = arith.constant 0 : index
    %c0_12 = arith.constant 0 : index
    %23 = vector.load %arg3[%c0_11, %c0_12] : memref<8x256xf32, #tpu.memory_space<vmem>>, vector<8x256xf32>
    tpu.vector_store %arg3[%c0_11, %c0_12], %22 {strides = array<i32>} : memref<8x256xf32, #tpu.memory_space<vmem>>, vector<8x256xf32>,
    return
  }
  func.func @transform_0(%arg0: i32) -> (i32, i32) {
    %c0_i32 = arith.constant 0 : i32
    %c0_i32_0 = arith.constant 0 : i32
    return %arg0, %c0_i32 : i32, i32
  }
  func.func @transform_1(%arg0: i32) -> (i32, i32) {
    %c0_i32 = arith.constant 0 : i32
    %c0_i32_0 = arith.constant 0 : i32
    return %arg0, %c0_i32 : i32, i32
  }
  func.func @transform_2(%arg0: i32) -> (i32, i32) {
    %c0_i32 = arith.constant 0 : i32
    %c0_i32_0 = arith.constant 0 : i32
    %c0_i32_1 = arith.constant 0 : i32
    return %c0_i32, %c0_i32_0 : i32, i32
  }
}

</mosaic_0001>

<bundles_post_ra>
// kernel: tpu_custom_call.1
= control target key start
LH: loop header
LB: loop body
LE: loop exit
PB: predicated region body
PF: predicated region fallthrough
CT: control target
= control target key end

     0   :  { %7 = vsyncpa [#allocation3], 0  ;;  %s224_s0 = inlined_call_operand.hbm [shape: f32[8,256], index: 0, kind: input, shape index: {}]   ;;  %s225_s1 = inlined_call_operand.hbm [shape: f32[8,256], index: 1, kind: input, shape index: {}]   ;;  %s226_s2 = inlined_call_operand.hbm [shape: f32[8,256], index: 2, kind: output, shape index: {}]  }
   0x1   :  { %8 = vsyncpa [#allocation6], 0 }
   0x2   :  { %9 = vsyncpa [#allocation4], 0  ;;  %s170_s9 = smov [#allocation2]   ;;  %s171_s11 = smov [#allocation5]  }
   0x3   :  { %s16_s10 = sshll.u32 %s170_s9, 4  ;;  %s26_s12 = sshll.u32 %s171_s11, 4  ;;  %s17_s10 = int_to_ptr.vmem [resolvable:$true] %s16_s10  ;;  %s27_s12 = int_to_ptr.vmem [resolvable:$true] %s26_s12 }
   0x4   :  { %s98_s15 = scalar_lea.hbm %s224_s0, 256 }
   0x5   :  { %p99_p0 = scmp.ne.s32.totalorder %s224_s0, %s98_s15  ;;  %p102_p1 = scmp.lt.u32.totalorder %s98_s15, %s224_s0 }
   0x7   :  { %p104_p2 = pnand %p102_p1, %p99_p0 }
   0x9   :  { %107 = shalt.err (!%p104_p2)
}
   0xa   :  { %s108_s20 = scalar_lea.vmem %s17_s10, 256  ;;  %p113_p4 = scmp.lt.s32.totalorder %s17_s10, %s17_s10 }
   0xb   :  { %p109_p3 = scmp.ne.s32.totalorder %s17_s10, %s108_s20  ;;  %p114_p5 = scmp.lt.s32.totalorder %s108_s20, %s108_s20 }
   0xd   :  { %p115_p6 = por %p114_p5, %p113_p4 }
   0xf   :  { %p116_p7 = pnand %p115_p6, %p109_p3 }
  0x11   :  { %119 = shalt.err (!%p116_p7)
}
  0x12   :  { %19 = dma.hbm_to_vmem [thread:$0]  %s224_s0, 256, %s17_s10, [#allocation3]  }
  0x13   :  { %s120_s25 = scalar_lea.hbm %s225_s1, 256 }
  0x14   :  { %p121_p8 = scmp.ne.s32.totalorder %s225_s1, %s120_s25  ;;  %p124_p9 = scmp.lt.u32.totalorder %s120_s25, %s225_s1 }
  0x16   :  { %p126_p10 = pnand %p124_p9, %p121_p8 }
  0x18   :  { %129 = shalt.err (!%p126_p10)
}
  0x19   :  { %s130_s30 = scalar_lea.vmem %s27_s12, 256  ;;  %p135_p12 = scmp.lt.s32.totalorder %s27_s12, %s27_s12 }
  0x1a   :  { %p131_p11 = scmp.ne.s32.totalorder %s27_s12, %s130_s30  ;;  %p136_p13 = scmp.lt.s32.totalorder %s130_s30, %s130_s30 }
  0x1c   :  { %p137_p0 = por %p136_p13, %p135_p12 }
  0x1e   :  { %p138_p1 = pnand %p137_p0, %p131_p11 }
  0x20   :  { %141 = shalt.err (!%p138_p1)
}
  0x21   :  { %29 = dma.hbm_to_vmem [thread:$0]  %s225_s1, 256, %s27_s12, [#allocation6]  }
  0x22   :  { %164 = dma.done.wait [#allocation3], 256  }
  0x23   :  { %165 = vsyncadd [#allocation3], 4294967040 }
  0x24   :  { %166 = dma.done.wait [#allocation6], 256  }
  0x25   :  { %167 = vsyncadd [#allocation6], 4294967040  ;;  %v42_v0 = vld [vmem:[#allocation2] sm:$0xff]  ;;  %v44_v1 = vld [vmem:[#allocation5] sm:$0xff]  ;;  %s172_s1 = smov [#allocation7]  }
  0x26   :  { %v43_v2 = vld [vmem:[#allocation2 + $0x8] sm:$0xff]  ;;  %vm46_vm0 = vcmp.ne.f32.partialorder %v44_v1, 0.0  ;;  %v48_v3 = vsub.f32 1.0, %v42_v0  ;;  %v45_v4 = vld [vmem:[#allocation5 + $0x8] sm:$0xff]  ;;  %s80_s4 = sshll.u32 %s172_s1, 4  ;;  %s81_s4 = int_to_ptr.vmem [resolvable:$true] %s80_s4 }
  0x27   :  { %v49_v5 = vsub.f32 1.0, %v43_v2  ;;  %vm47_vm1 = vcmp.ne.f32.partialorder %v45_v4, 0.0  ;;  %s142_s5 = scalar_lea.vmem %s81_s4, 256  ;;  %p147_p3 = scmp.lt.s32.totalorder %s81_s4, %s81_s4 }
  0x28   :  { %v50_v6 = vsel %vm46_vm0, %v42_v0, %v48_v3  ;;  %p143_p2 = scmp.ne.s32.totalorder %s81_s4, %s142_s5  ;;  %p148_p4 = scmp.lt.s32.totalorder %s142_s5, %s142_s5 }
  0x29   :  { %v51_v7 = vsel %vm47_vm1, %v43_v2, %v49_v5  ;;  %94 = vlog2.f32 %v50_v6  ;;  %v60_v8 = vsub.f32 1.0, %v50_v6 }
  0x2a   :  { %96 = vlog2.f32 %v51_v7  ;;  %v61_v10 = vsub.f32 1.0, %v51_v7  ;;  %p149_p5 = por %p148_p4, %p147_p3 }
  0x2b   :  { %v62_v15 = vmul.f32 %v60_v8, %v60_v8 }
  0x2c   :  { %v63_v17 = vmul.f32 %v61_v10, %v61_v10  ;;  %p150_p6 = pnand %p149_p5, %p143_p2 }
  0x33   :  { %v95_v9 = vpop.eup %94 }
  0x34   :  { %v97_v11 = vpop.eup %96  ;;  %v53_v12 = vmul.f32 0.6931472, %v95_v9 }
  0x35   :  { %v55_v13 = vmul.f32 0.6931472, %v97_v11 }
  0x36   :  { %v56_v14 = vsub.f32 0.0, %v53_v12 }
  0x37   :  { %v57_v16 = vsub.f32 0.0, %v55_v13 }
  0x38   :  { %v58_v18 = vmin.f32 %v56_v14, 100.0 }
  0x39   :  { %v59_v19 = vmin.f32 %v57_v16, 100.0 }
  0x3a   :  { %v64_v20 = vmul.f32 %v62_v15, %v58_v18 }
  0x3b   :  { %v65_v21 = vmul.f32 %v63_v17, %v59_v19 }
  0x3c   :  { %72 = vst [vmem:[#allocation7] sm:$0xff] %v64_v20 }
  0x3d   :  { %73 = vst [vmem:[#allocation7 + $0x8] sm:$0xff] %v65_v21 }
  0x3e   :  { %153 = shalt.err (!%p150_p6)
}
  0x3f   :  { %s154_s8 = scalar_lea.hbm %s226_s2, 256 }
  0x40   :  { %p155_p7 = scmp.ne.s32.totalorder %s226_s2, %s154_s8  ;;  %p158_p8 = scmp.lt.u32.totalorder %s154_s8, %s226_s2 }
  0x42   :  { %p160_p9 = pnand %p158_p8, %p155_p7 }
  0x44   :  { %163 = shalt.err (!%p160_p9)
}
  0x45   :  { %83 = dma.vmem_to_hbm [thread:$0]  %s81_s4, 256, %s226_s2, [#allocation4]  }
  0x46   :  { %168 = dma.done.wait [#allocation4], 256  }
  0x47   :  { %169 = vsyncadd [#allocation4], 4294967040 }
  0x48   :  { %87 = vsyncpa [#allocation3], 1 }
  0x49   :  { %88 = vsyncpa [#allocation6], 1 }
  0x4a   :  { %89 = vsyncpa [#allocation4], 1 }

</bundles_post_ra>
